<compile_context>
chip_gen: v7x
topology: tpu7x:2x2x1
jax: 0.10.0
libtpu: 0.0.40
codegen_flags: <defaults>
</compile_context>

<pallas_src>
import jax
import jax.numpy as jnp
from jax.experimental import pallas as pl
from jax.experimental.pallas import tpu as pltpu


def _round_up(x, m):
    return (x + m - 1) // m * m


def mlp_kernel(x_ref, w1_ref, b1_ref, w2_ref, b2_ref, w3_ref, b3_ref,
               w4_ref, b4_ref, o_ref):
    """Fused 4-layer MLP: h = relu(h @ W_l + b_l), l = 0..3 (dropout = eval identity).

    x_ref  : (TB, Ip)       bf16 activations (zero-padded lanes)
    w*_ref : (Kp_l, Np_l)   bf16 per-layer weights, (in, out) layout, zero-padded
    b*_ref : (1, Np_l)      f32 per-layer biases, zero-padded
    o_ref  : (TB, Op)       f32 output (first out_dim lanes valid)
    """
    # Layer 1: input already bf16, no extra cast.
    h = jnp.dot(x_ref[...], w1_ref[...], preferred_element_type=jnp.float32)
    h = jnp.maximum(h + b1_ref[...], 0.0)
    # dropout (eval mode) after layers 1 and 2 -> identity
    for w_ref, b_ref in ((w2_ref, b2_ref), (w3_ref, b3_ref), (w4_ref, b4_ref)):
        h = jnp.dot(h.astype(jnp.bfloat16), w_ref[...],
                    preferred_element_type=jnp.float32)
        h = jnp.maximum(h + b_ref[...], 0.0)
    o_ref[...] = h


def prepare_params(params):
    """Pad each layer's (W, b) to lane-aligned shapes. Call ONCE, reuse across calls.

    Weights stored (in, out) = PyTorch weight.T, cast to bf16; biases stay f32.
    Zero padding is exact: padded lanes stay 0 through every layer
    (zero weight rows/cols, zero bias, ReLU(0) = 0).
    """
    packed = []
    for (w, b) in params:
        fi, fo = w.shape
        ip, op = _round_up(fi, 128), _round_up(fo, 128)
        wp = jnp.zeros((ip, op), jnp.bfloat16).at[:fi, :fo].set(w.astype(jnp.bfloat16))
        bp = jnp.zeros((1, op), jnp.float32).at[:, :fo].set(
            b.reshape(1, -1).astype(jnp.float32))
        packed.append((wp, bp))
    return packed


def _pick_batch_tile(batch):
    rows = _round_up(max(batch, 1), 8)
    if rows <= 16:
        return rows
    # Target 512-1024 rows/tile (tile sweeps show ~85% of HBM roofline at 512+),
    # but keep >= 2 grid steps so v7x can shard "parallel" across its 2 TCs.
    half = _round_up((rows + 1) // 2, 8)
    return max(8, min(1024, half))


@jax.jit
def net_forward(x, packed_params):
    """x: (B, ...) — flattened inside (matches x.view(x.size(0), -1))."""
    B = x.shape[0]
    x2d = x.reshape(B, -1)
    in_dim = x2d.shape[1]

    (w1, b1), (w2, b2), (w3, b3), (w4, b4) = packed_params
    ip0 = w1.shape[0]                      # padded flattened-input width
    op_last = w4.shape[1]                  # padded output width (decoupled)
    out_dim_valid = op_last                # sliced to true out_dim by caller pad info

    tb = _pick_batch_tile(B)
    b_pad = _round_up(B, tb)

    # Activations enter the kernel in bf16 (halves input DMA; cast happened
    # before the first dot anyway).
    x_padded = jnp.zeros((b_pad, ip0), jnp.bfloat16)
    x_padded = x_padded.at[:B, :in_dim].set(x2d.astype(jnp.bfloat16))

    in_specs = [pl.BlockSpec((tb, ip0), lambda i: (i, 0))]
    for (wp, bp) in packed_params:
        kin, kout = wp.shape
        in_specs.append(pl.BlockSpec((kin, kout), lambda i: (0, 0)))   # weight
        in_specs.append(pl.BlockSpec((1, kout), lambda i: (0, 0)))     # bias

    out = pl.pallas_call(
        mlp_kernel,
        out_shape=jax.ShapeDtypeStruct((b_pad, op_last), jnp.float32),
        grid_spec=pl.GridSpec(
            grid=(b_pad // tb,),
            in_specs=in_specs,
            out_specs=pl.BlockSpec((tb, op_last), lambda i: (i, 0)),
        ),
        compiler_params=pltpu.CompilerParams(
            dimension_semantics=("parallel",),
            vmem_limit_bytes=32 * 1024 * 1024,   # headroom under v7x 64 MiB physical
        ),
    )(x_padded, w1, b1, w2, b2, w3, b3, w4, b4)

    return out[:B, :out_dim_valid]


def init_params(key, input_dim, hidden_dim, output_dim):
    """Deterministic init. Weights stored as (in, out) = PyTorch weight.T."""
    assert len(hidden_dim) == 3, 'hidden_dims list must contain three elements'
    dims = [input_dim] + list(hidden_dim) + [output_dim]
    params = []
    for i in range(4):
        key, kw, kb = jax.random.split(key, 3)
        fan_in, fan_out = dims[i], dims[i + 1]
        bound = 1.0 / (fan_in ** 0.5)  # PyTorch nn.Linear default init range
        w = jax.random.uniform(kw, (fan_in, fan_out), jnp.float32, -bound, bound)
        b = jax.random.uniform(kb, (1, fan_out), jnp.float32, -bound, bound)
        params.append((w, b))
    return params


def reference_forward(x, params):
    """Pure-JAX reference with the same bf16-weight/activation, f32-accum arithmetic."""
    B = x.shape[0]
    h = x.reshape(B, -1).astype(jnp.float32)
    for (w, b) in params:
        h = jnp.dot(h.astype(jnp.bfloat16), w.astype(jnp.bfloat16),
                    preferred_element_type=jnp.float32) + b.reshape(1, -1)
        h = jnp.maximum(h, 0.0)
    return h


if __name__ == "__main__":
    key = jax.random.PRNGKey(0)

    # Small shapes consistent with the module: flatten (2, 4, 4, 4) -> (2, 64)
    B = 2
    input_dim = 4 * 4 * 4
    hidden_dim = [32, 32, 32]
    output_dim = 8
    dropout_prob = 0.5  # inactive in eval mode

    k_x, k_p = jax.random.split(key)
    x = jax.random.normal(k_x, (B, 4, 4, 4), jnp.float32)
    params = init_params(k_p, input_dim, hidden_dim, output_dim)

    # Pad/pack parameters ONCE (hoisted out of the per-call path).
    packed_params = prepare_params(params)

    out_padded = net_forward(x, packed_params)
    out_padded = jax.block_until_ready(out_padded)
    out = out_padded[:, :output_dim]

    ref = reference_forward(x, params)
    assert out.shape == (B, output_dim)
    assert jnp.allclose(out, ref, atol=1e-3, rtol=1e-3), "mismatch vs reference"

    print("KERNEL_OK")
</pallas_src>

<mosaic_0001>
module attributes {stable_mosaic.version = 11 : i64} {
  func.func @mlp_kernel(%arg0: i32, %arg1: memref<8x128xbf16, #tpu.memory_space<vmem>>, %arg2: memref<128x128xbf16, #tpu.memory_space<vmem>>, %arg3: memref<1x128xf32, #tpu.memory_space<vmem>>, %arg4: memref<128x128xbf16, #tpu.memory_space<vmem>>, %arg5: memref<1x128xf32, #tpu.memory_space<vmem>>, %arg6: memref<128x128xbf16, #tpu.memory_space<vmem>>, %arg7: memref<1x128xf32, #tpu.memory_space<vmem>>, %arg8: memref<128x128xbf16, #tpu.memory_space<vmem>>, %arg9: memref<1x128xf32, #tpu.memory_space<vmem>>, %arg10: memref<8x128xf32, #tpu.memory_space<vmem>>) attributes {dimension_semantics = [#tpu.dimension_semantics<parallel>], iteration_bounds = array<i64: 1>, scalar_prefetch = 0 : i64, scratch_operands = 0 : i64, tpu.core_type = #tpu.core_type<tc>, window_params = [{transform_indices = @transform_0, window_bounds = array<i64: 8, 128>}, {pipeline_mode = #tpu.pipeline_mode<synchronous>, transform_indices = @transform_1, window_bounds = array<i64: 128, 128>}, {pipeline_mode = #tpu.pipeline_mode<synchronous>, transform_indices = @transform_2, window_bounds = array<i64: 1, 128>}, {pipeline_mode = #tpu.pipeline_mode<synchronous>, transform_indices = @transform_3, window_bounds = array<i64: 128, 128>}, {pipeline_mode = #tpu.pipeline_mode<synchronous>, transform_indices = @transform_4, window_bounds = array<i64: 1, 128>}, {pipeline_mode = #tpu.pipeline_mode<synchronous>, transform_indices = @transform_5, window_bounds = array<i64: 128, 128>}, {pipeline_mode = #tpu.pipeline_mode<synchronous>, transform_indices = @transform_6, window_bounds = array<i64: 1, 128>}, {pipeline_mode = #tpu.pipeline_mode<synchronous>, transform_indices = @transform_7, window_bounds = array<i64: 128, 128>}, {pipeline_mode = #tpu.pipeline_mode<synchronous>, transform_indices = @transform_8, window_bounds = array<i64: 1, 128>}, {transform_indices = @transform_9, window_bounds = array<i64: 8, 128>}]} {
    %c0 = arith.constant 0 : index
    %c0_0 = arith.constant 0 : index
    %0 = vector.load %arg1[%c0, %c0_0] : memref<8x128xbf16, #tpu.memory_space<vmem>>, vector<8x128xbf16>
    %c0_1 = arith.constant 0 : index
    %c0_2 = arith.constant 0 : index
    %1 = vector.load %arg2[%c0_1, %c0_2] : memref<128x128xbf16, #tpu.memory_space<vmem>>, vector<128x128xbf16>
    %cst = arith.constant dense<0.000000e+00> : vector<8x128xf32>
    %2 = tpu.matmul %0, %1, %cst {dimension_numbers = #tpu.dot_dimension_numbers<[1], [0], [0], [1], [0, 0, 1, 1], [], []>} : vector<8x128xbf16>, vector<128x128xbf16>, vector<8x128xf32> -> vector<8x128xf32>
    %c0_3 = arith.constant 0 : index
    %c0_4 = arith.constant 0 : index
    %3 = vector.load %arg3[%c0_3, %c0_4] : memref<1x128xf32, #tpu.memory_space<vmem>>, vector<1x128xf32>
    %4 = vector.broadcast %3 : vector<1x128xf32> to vector<8x128xf32>
    %5 = arith.addf %2, %4 : vector<8x128xf32>
    %cst_5 = arith.constant 0.000000e+00 : f32
    %6 = vector.broadcast %cst_5 : f32 to vector<8x128xf32>
    %7 = arith.maximumf %5, %6 : vector<8x128xf32>
    %8 = arith.truncf %7 : vector<8x128xf32> to vector<8x128xbf16>
    %c0_6 = arith.constant 0 : index
    %c0_7 = arith.constant 0 : index
    %9 = vector.load %arg4[%c0_6, %c0_7] : memref<128x128xbf16, #tpu.memory_space<vmem>>, vector<128x128xbf16>
    %cst_8 = arith.constant dense<0.000000e+00> : vector<8x128xf32>
    %10 = tpu.matmul %8, %9, %cst_8 {dimension_numbers = #tpu.dot_dimension_numbers<[1], [0], [0], [1], [0, 0, 1, 1], [], []>} : vector<8x128xbf16>, vector<128x128xbf16>, vector<8x128xf32> -> vector<8x128xf32>
    %c0_9 = arith.constant 0 : index
    %c0_10 = arith.constant 0 : index
    %11 = vector.load %arg5[%c0_9, %c0_10] : memref<1x128xf32, #tpu.memory_space<vmem>>, vector<1x128xf32>
    %12 = vector.broadcast %11 : vector<1x128xf32> to vector<8x128xf32>
    %13 = arith.addf %10, %12 : vector<8x128xf32>
    %cst_11 = arith.constant 0.000000e+00 : f32
    %14 = vector.broadcast %cst_11 : f32 to vector<8x128xf32>
    %15 = arith.maximumf %13, %14 : vector<8x128xf32>
    %16 = arith.truncf %15 : vector<8x128xf32> to vector<8x128xbf16>
    %c0_12 = arith.constant 0 : index
    %c0_13 = arith.constant 0 : index
    %17 = vector.load %arg6[%c0_12, %c0_13] : memref<128x128xbf16, #tpu.memory_space<vmem>>, vector<128x128xbf16>
    %cst_14 = arith.constant dense<0.000000e+00> : vector<8x128xf32>
    %18 = tpu.matmul %16, %17, %cst_14 {dimension_numbers = #tpu.dot_dimension_numbers<[1], [0], [0], [1], [0, 0, 1, 1], [], []>} : vector<8x128xbf16>, vector<128x128xbf16>, vector<8x128xf32> -> vector<8x128xf32>
    %c0_15 = arith.constant 0 : index
    %c0_16 = arith.constant 0 : index
    %19 = vector.load %arg7[%c0_15, %c0_16] : memref<1x128xf32, #tpu.memory_space<vmem>>, vector<1x128xf32>
    %20 = vector.broadcast %19 : vector<1x128xf32> to vector<8x128xf32>
    %21 = arith.addf %18, %20 : vector<8x128xf32>
    %cst_17 = arith.constant 0.000000e+00 : f32
    %22 = vector.broadcast %cst_17 : f32 to vector<8x128xf32>
    %23 = arith.maximumf %21, %22 : vector<8x128xf32>
    %24 = arith.truncf %23 : vector<8x128xf32> to vector<8x128xbf16>
    %c0_18 = arith.constant 0 : index
    %c0_19 = arith.constant 0 : index
    %25 = vector.load %arg8[%c0_18, %c0_19] : memref<128x128xbf16, #tpu.memory_space<vmem>>, vector<128x128xbf16>
    %cst_20 = arith.constant dense<0.000000e+00> : vector<8x128xf32>
    %26 = tpu.matmul %24, %25, %cst_20 {dimension_numbers = #tpu.dot_dimension_numbers<[1], [0], [0], [1], [0, 0, 1, 1], [], []>} : vector<8x128xbf16>, vector<128x128xbf16>, vector<8x128xf32> -> vector<8x128xf32>
    %c0_21 = arith.constant 0 : index
    %c0_22 = arith.constant 0 : index
    %27 = vector.load %arg9[%c0_21, %c0_22] : memref<1x128xf32, #tpu.memory_space<vmem>>, vector<1x128xf32>
    %28 = vector.broadcast %27 : vector<1x128xf32> to vector<8x128xf32>
    %29 = arith.addf %26, %28 : vector<8x128xf32>
    %cst_23 = arith.constant 0.000000e+00 : f32
    %30 = vector.broadcast %cst_23 : f32 to vector<8x128xf32>
    %31 = arith.maximumf %29, %30 : vector<8x128xf32>
    %c0_24 = arith.constant 0 : index
    %c0_25 = arith.constant 0 : index
    %32 = vector.load %arg10[%c0_24, %c0_25] : memref<8x128xf32, #tpu.memory_space<vmem>>, vector<8x128xf32>
    tpu.vector_store %arg10[%c0_24, %c0_25], %31 {strides = array<i32>} : memref<8x128xf32, #tpu.memory_space<vmem>>, vector<8x128xf32>,
    return
  }
  func.func @transform_0(%arg0: i32) -> (i32, i32) {
    %c0_i32 = arith.constant 0 : i32
    %c0_i32_0 = arith.constant 0 : i32
    return %arg0, %c0_i32 : i32, i32
  }
  func.func @transform_1(%arg0: i32) -> (i32, i32) {
    %c0_i32 = arith.constant 0 : i32
    %c0_i32_0 = arith.constant 0 : i32
    %c0_i32_1 = arith.constant 0 : i32
    return %c0_i32, %c0_i32_0 : i32, i32
  }
  func.func @transform_2(%arg0: i32) -> (i32, i32) {
    %c0_i32 = arith.constant 0 : i32
    %c0_i32_0 = arith.constant 0 : i32
    %c0_i32_1 = arith.constant 0 : i32
    return %c0_i32, %c0_i32_0 : i32, i32
  }
  func.func @transform_3(%arg0: i32) -> (i32, i32) {
    %c0_i32 = arith.constant 0 : i32
    %c0_i32_0 = arith.constant 0 : i32
    %c0_i32_1 = arith.constant 0 : i32
    return %c0_i32, %c0_i32_0 : i32, i32
  }
  func.func @transform_4(%arg0: i32) -> (i32, i32) {
    %c0_i32 = arith.constant 0 : i32
    %c0_i32_0 = arith.constant 0 : i32
    %c0_i32_1 = arith.constant 0 : i32
    return %c0_i32, %c0_i32_0 : i32, i32
  }
  func.func @transform_5(%arg0: i32) -> (i32, i32) {
    %c0_i32 = arith.constant 0 : i32
    %c0_i32_0 = arith.constant 0 : i32
    %c0_i32_1 = arith.constant 0 : i32
    return %c0_i32, %c0_i32_0 : i32, i32
  }
  func.func @transform_6(%arg0: i32) -> (i32, i32) {
    %c0_i32 = arith.constant 0 : i32
    %c0_i32_0 = arith.constant 0 : i32
    %c0_i32_1 = arith.constant 0 : i32
    return %c0_i32, %c0_i32_0 : i32, i32
  }
  func.func @transform_7(%arg0: i32) -> (i32, i32) {
    %c0_i32 = arith.constant 0 : i32
    %c0_i32_0 = arith.constant 0 : i32
    %c0_i32_1 = arith.constant 0 : i32
    return %c0_i32, %c0_i32_0 : i32, i32
  }
  func.func @transform_8(%arg0: i32) -> (i32, i32) {
    %c0_i32 = arith.constant 0 : i32
    %c0_i32_0 = arith.constant 0 : i32
    %c0_i32_1 = arith.constant 0 : i32
    return %c0_i32, %c0_i32_0 : i32, i32
  }
  func.func @transform_9(%arg0: i32) -> (i32, i32) {
    %c0_i32 = arith.constant 0 : i32
    %c0_i32_0 = arith.constant 0 : i32
    return %arg0, %c0_i32 : i32, i32
  }
}

</mosaic_0001>

<bundles_post_ra>
// kernel: net_forward.1
= control target key start
LH: loop header
LB: loop body
LE: loop exit
PB: predicated region body
PF: predicated region fallthrough
CT: control target
= control target key end

     0   :  { %14 = vsyncpa [#allocation3], 0  ;;  %s985_s0 = inlined_call_operand.vmem [shape: bf16[8,128], index: 0, kind: input, shape index: {}]   ;;  %s986_s1 = inlined_call_operand.vmem [shape: bf16[128,128], index: 1, kind: input, shape index: {}]   ;;  %s987_s2 = inlined_call_operand.vmem [shape: f32[1,128], index: 2, kind: input, shape index: {}]   ;;  %s988_s3 = inlined_call_operand.hbm [shape: bf16[128,128], index: 3, kind: input, shape index: {}]   ;;  %s989_s4 = inlined_call_operand.vmem [shape: f32[1,128], index: 4, kind: input, shape index: {}]   ;;  %s990_s5 = inlined_call_operand.hbm [shape: bf16[128,128], index: 5, kind: input, shape index: {}]   ;;  %s991_s6 = inlined_call_operand.vmem [shape: f32[1,128], index: 6, kind: input, shape index: {}]   ;;  %s992_s7 = inlined_call_operand.hbm [shape: bf16[128,128], index: 7, kind: input, shape index: {}]   ;;  %s993_s8 = inlined_call_operand.vmem [shape: f32[1,128], index: 8, kind: input, shape index: {}]   ;;  %s994_s9 = inlined_call_operand.vmem [shape: f32[8,128], index: 9, kind: output, shape index: {}]  }
   0x1   :  { %15 = vsyncpa [#allocation5], 0  ;;  %s794_s30 = smov [#allocation4]   ;;  %s795_s11 = smov [#allocation2]  }
   0x2   :  { %s41_s10 = sshll.u32 %s794_s30, 4  ;;  %s27_s12 = sshll.u32 %s795_s11, 4  ;;  %s42_s10 = int_to_ptr.vmem [resolvable:$true] %s41_s10  ;;  %s851_s12 = int_to_ptr.vmem [resolvable:$true] %s27_s12 }
   0x3   :  { %s724_s15 = scalar_lea.hbm %s990_s5, 1024 }
   0x4   :  { %p725_p0 = scmp.ne.s32.totalorder %s990_s5, %s724_s15  ;;  %p728_p1 = scmp.lt.u32.totalorder %s724_s15, %s990_s5 }
   0x6   :  { %p730_p2 = pnand %p728_p1, %p725_p0 }
   0x8   :  { %733 = shalt.err (!%p730_p2)
}
   0x9   :  { %s734_s20 = scalar_lea.vmem %s42_s10, 1024  ;;  %p739_p4 = scmp.lt.s32.totalorder %s42_s10, %s42_s10 }
   0xa   :  { %p735_p3 = scmp.ne.s32.totalorder %s42_s10, %s734_s20  ;;  %p740_p5 = scmp.lt.s32.totalorder %s734_s20, %s734_s20 }
   0xc   :  { %p741_p6 = por %p740_p5, %p739_p4 }
   0xe   :  { %p742_p7 = pnand %p741_p6, %p735_p3 }
  0x10   :  { %745 = shalt.err (!%p742_p7)
}
  0x11   :  { %s796_s21 = smov 64   ;;  %s797_s22 = smov 4  }
  0x12   :  { %47 = dma.hbm_to_vmem [thread:$0]  %s990_s5, 1024, %s42_s10, [#allocation5], %s796_s21, %s796_s21, %s797_s22  }
  0x13   :  { %s746_s27 = scalar_lea.hbm %s988_s3, 1024 }
  0x14   :  { %p747_p8 = scmp.ne.s32.totalorder %s988_s3, %s746_s27  ;;  %p750_p9 = scmp.lt.u32.totalorder %s746_s27, %s988_s3 }
  0x16   :  { %p752_p10 = pnand %p750_p9, %p747_p8 }
  0x18   :  { %755 = shalt.err (!%p752_p10)
}
  0x19   :  { %s756_s13 = scalar_lea.vmem %s851_s12, 1024  ;;  %p761_p12 = scmp.lt.s32.totalorder %s851_s12, %s851_s12 }
  0x1a   :  { %p757_p11 = scmp.ne.s32.totalorder %s851_s12, %s756_s13  ;;  %p762_p13 = scmp.lt.s32.totalorder %s756_s13, %s756_s13 }
  0x1c   :  { %p763_p0 = por %p762_p13, %p761_p12 }
  0x1e   :  { %p764_p1 = pnand %p763_p0, %p757_p11 }
  0x20   :  { %767 = shalt.err (!%p764_p1)
}
  0x21   :  { %33 = dma.hbm_to_vmem [thread:$0]  %s988_s3, 1024, %s851_s12, [#allocation3], %s796_s21, %s796_s21, %s797_s22  }
  0x22   :  { %s798_s14 = smov [#allocation6]   ;;  %s768_s18 = scalar_lea.hbm %s992_s7, 1024 }
  0x23   :  { %s55_s15 = sshll.u32 %s798_s14, 4  ;;  %p769_p2 = scmp.ne.s32.totalorder %s992_s7, %s768_s18  ;;  %s56_s15 = int_to_ptr.vmem [resolvable:$true] %s55_s15 }
  0x24   :  { %p772_p3 = scmp.lt.u32.totalorder %s768_s18, %s992_s7 }
  0x26   :  { %p774_p4 = pnand %p772_p3, %p769_p2 }
  0x28   :  { %777 = shalt.err (!%p774_p4)
}
  0x29   :  { %s778_s25 = scalar_lea.vmem %s56_s15, 1024  ;;  %p783_p6 = scmp.lt.s32.totalorder %s56_s15, %s56_s15 }
  0x2a   :  { %p779_p5 = scmp.ne.s32.totalorder %s56_s15, %s778_s25  ;;  %p784_p7 = scmp.lt.s32.totalorder %s778_s25, %s778_s25 }
  0x2c   :  { %p785_p8 = por %p784_p7, %p783_p6 }
  0x2e   :  { %p786_p9 = pnand %p785_p8, %p779_p5 }
  0x30   :  { %789 = shalt.err (!%p786_p9)
}
  0x31   :  { %61 = dma.hbm_to_vmem [thread:$0]  %s992_s7, 1024, %s56_s15, [#allocation5], %s796_s21, %s796_s21, %s797_s22  }
  0x32   :  { %790 = dma.done.wait [#allocation3], 1024  }
  0x33   :  { %791 = vsyncadd [#allocation3], 4294966272 }
  0x34   :  { %792 = dma.done.wait [#allocation5], 2048  }
  0x35   :  { %793 = vsyncadd [#allocation5], 4294965248  ;;  %v799_v0 = vmov 0.0   ;;  %vm800_vm0 = vmmov 0   ;;  %v692_v1 = vld [vmem:[%s986_s1] sm:$0xff]   ;;  %v693_v2 = vld [vmem:[%s986_s1 + $0x8] sm:$0xff]  }
  0x36   :  { %605 = vmatprep.subr.bf16.mxu0 %v799_v0  ;;  %621 = vmatprep.mubr.msk.bf16.mxu0 %vm800_vm0, %v799_v0  ;;  %v694_v3 = vld [vmem:[%s986_s1 + $0x10] sm:$0xff]   ;;  %v700_v4 = vld [vmem:[#allocation2] sm:$0xff]   ;;  %v695_v5 = vld [vmem:[%s986_s1 + $0x18] sm:$0xff]  }
  0x37   :  { %625 = vmatprep.subr.bf16.mxu1 %v799_v0  ;;  %641 = vmatprep.mubr.msk.bf16.mxu1 %vm800_vm0, %v799_v0  ;;  %v701_v6 = vld [vmem:[#allocation2 + $0x8] sm:$0xff]   ;;  %v696_v7 = vld [vmem:[%s986_s1 + $0x20] sm:$0xff]   ;;  %v702_v8 = vld [vmem:[#allocation2 + $0x10] sm:$0xff]  }
  0x38   :  { %606 = vmatpush3.bf16.msra.mxu0 %v692_v1  ;;  %626 = vmatpush3.bf16.msra.mxu1 %v700_v4  ;;  %v697_v9 = vld [vmem:[%s986_s1 + $0x28] sm:$0xff]   ;;  %v703_v10 = vld [vmem:[#allocation2 + $0x18] sm:$0xff]   ;;  %v698_v11 = vld [vmem:[%s986_s1 + $0x30] sm:$0xff]  }
  0x39   :  { %607 = vmatprep.subr.bf16.mxu0 %v799_v0  ;;  %627 = vmatprep.subr.bf16.mxu1 %v799_v0  ;;  %v704_v12 = vld [vmem:[#allocation2 + $0x20] sm:$0xff]   ;;  %v699_v13 = vld [vmem:[%s986_s1 + $0x38] sm:$0xff]   ;;  %v705_v14 = vld [vmem:[#allocation2 + $0x28] sm:$0xff]  }
  0x3a   :  { %v74_v15 = vld [vmem:[%s985_s0] sm:$0xf]  ;;  %v706_v16 = vld [vmem:[#allocation2 + $0x30] sm:$0xff]   ;;  %v707_v17 = vld [vmem:[#allocation2 + $0x38] sm:$0xff]  }
  0x3b   :  { %v708_v18 = vld [vmem:[#allocation4] sm:$0xff]   ;;  %v709_v19 = vld [vmem:[#allocation4 + $0x8] sm:$0xff]   ;;  %v710_v20 = vld [vmem:[#allocation4 + $0x10] sm:$0xff]  }
  0x3c   :  { %608 = vmatpush3.bf16.msra.mxu0 %v693_v2  ;;  %628 = vmatpush3.bf16.msra.mxu1 %v701_v6  ;;  %v711_v21 = vld [vmem:[#allocation4 + $0x18] sm:$0xff]   ;;  %v712_v22 = vld [vmem:[#allocation4 + $0x20] sm:$0xff]   ;;  %v713_v23 = vld [vmem:[#allocation4 + $0x28] sm:$0xff]  }
  0x3d   :  { %609 = vmatprep.subr.bf16.mxu0 %v799_v0  ;;  %629 = vmatprep.subr.bf16.mxu1 %v799_v0  ;;  %v533_v24 = vld [vmem:[%s987_s2] ss:$0 sm:$0xff]  ;;  %v714_v32 = vld [vmem:[#allocation4 + $0x30] sm:$0xff]   ;;  %v715_v33 = vld [vmem:[#allocation4 + $0x38] sm:$0xff]  }
  0x3e   :  { %v716_v34 = vld [vmem:[#allocation6] sm:$0xff]   ;;  %v717_v35 = vld [vmem:[#allocation6 + $0x8] sm:$0xff]   ;;  %v718_v36 = vld [vmem:[#allocation6 + $0x10] sm:$0xff]  }
  0x3f   :  { %v719_v37 = vld [vmem:[#allocation6 + $0x18] sm:$0xff]   ;;  %v720_v38 = vld [vmem:[#allocation6 + $0x20] sm:$0xff]   ;;  %v721_v39 = vld [vmem:[#allocation6 + $0x28] sm:$0xff]  }
  0x40   :  { %610 = vmatpush3.bf16.msra.mxu0 %v694_v3  ;;  %630 = vmatpush3.bf16.msra.mxu1 %v702_v8  ;;  %v542_v40 = vld [vmem:[%s989_s4] ss:$0 sm:$0xff]  ;;  %v722_v48 = vld [vmem:[#allocation6 + $0x30] sm:$0xff]   ;;  %v723_v49 = vld [vmem:[#allocation6 + $0x38] sm:$0xff]  }
  0x41   :  { %611 = vmatprep.subr.bf16.mxu0 %v799_v0  ;;  %631 = vmatprep.subr.bf16.mxu1 %v799_v0  ;;  %v551_v50 = vld [vmem:[%s991_s6] ss:$0 sm:$0xff] }
  0x42   :  { %v560_v58 = vld [vmem:[%s993_s8] ss:$0 sm:$0xff] }
  0x44   :  { %612 = vmatpush3.bf16.msra.mxu0 %v695_v5  ;;  %632 = vmatpush3.bf16.msra.mxu1 %v703_v10 }
  0x45   :  { %613 = vmatprep.subr.bf16.mxu0 %v799_v0  ;;  %633 = vmatprep.subr.bf16.mxu1 %v799_v0 }
  0x48   :  { %614 = vmatpush3.bf16.msra.mxu0 %v696_v7  ;;  %634 = vmatpush3.bf16.msra.mxu1 %v704_v12 }
  0x49   :  { %615 = vmatprep.subr.bf16.mxu0 %v799_v0  ;;  %635 = vmatprep.subr.bf16.mxu1 %v799_v0 }
  0x4c   :  { %616 = vmatpush3.bf16.msra.mxu0 %v697_v9  ;;  %636 = vmatpush3.bf16.msra.mxu1 %v705_v14 }
  0x4d   :  { %617 = vmatprep.subr.bf16.mxu0 %v799_v0  ;;  %637 = vmatprep.subr.bf16.mxu1 %v799_v0 }
  0x50   :  { %618 = vmatpush3.bf16.msra.mxu0 %v698_v11  ;;  %638 = vmatpush3.bf16.msra.mxu1 %v706_v16 }
  0x51   :  { %619 = vmatprep.subr.bf16.mxu0 %v799_v0  ;;  %639 = vmatprep.subr.bf16.mxu1 %v799_v0 }
  0x54   :  { %620 = vmatpush3.bf16.msra.mxu0 %v699_v13  ;;  %640 = vmatpush3.bf16.msra.mxu1 %v707_v17 }
  0x55   :  { %645 = vmatprep.subr.bf16.mxu0 %v799_v0  ;;  %665 = vmatprep.subr.bf16.mxu1 %v799_v0 }
  0x57   :  { %622 = vmatmul.mubr.bf16.vlgmr.msra.gmra.mrb[0].mxu0 %v74_v15 }
  0x58   :  { %661 = vmatprep.mubr.msk.bf16.mxu0 %vm800_vm0, %v799_v0  ;;  %646 = vmatpush3.bf16.msra.mxu0 %v708_v18 }
  0x59   :  { %647 = vmatprep.subr.bf16.mxu0 %v799_v0 }
  0x5c   :  { %648 = vmatpush3.bf16.msra.mxu0 %v709_v19 }
  0x5d   :  { %649 = vmatprep.subr.bf16.mxu0 %v799_v0 }
  0x60   :  { %650 = vmatpush3.bf16.msra.mxu0 %v710_v20 }
  0x61   :  { %651 = vmatprep.subr.bf16.mxu0 %v799_v0 }
  0x64   :  { %652 = vmatpush3.bf16.msra.mxu0 %v711_v21 }
  0x65   :  { %653 = vmatprep.subr.bf16.mxu0 %v799_v0 }
  0x68   :  { %654 = vmatpush3.bf16.msra.mxu0 %v712_v22 }
  0x69   :  { %655 = vmatprep.subr.bf16.mxu0 %v799_v0 }
  0x6c   :  { %656 = vmatpush3.bf16.msra.mxu0 %v713_v23 }
  0x6d   :  { %657 = vmatprep.subr.bf16.mxu0 %v799_v0 }
  0x70   :  { %658 = vmatpush3.bf16.msra.mxu0 %v714_v32 }
  0x71   :  { %659 = vmatprep.subr.bf16.mxu0 %v799_v0 }
  0x74   :  { %660 = vmatpush3.bf16.msra.mxu0 %v715_v33 }
 0x12a   :  { %v180_v25 = vpop.f32.mrb[0].mxu0 }
 0x12b   :  { %v181_v26 = vadd.f32 %v533_v24, %v180_v25  ;;  %v623_v27 = vpop.f32.mrb[1].mxu0 }
 0x12c   :  { %v183_v28 = vpop.f32.mrb[2].mxu0 }
 0x12d   :  { %v186_v29 = vmax.f32 %v181_v26, 0.0  ;;  %v624_v30 = vpop.f32.mrb[3].mxu0 }
 0x12f   :  { %v187_v31 = vpack.c.bf16 %v186_v29, %v186_v29 }
 0x131   :  { %642 = vmatmul.mubr.bf16.vlgmr.msra.gmra.mrb[0].mxu1 %v187_v31 }
 0x132   :  { %681 = vmatprep.mubr.msk.bf16.mxu1 %vm800_vm0, %v799_v0  ;;  %666 = vmatpush3.bf16.msra.mxu1 %v716_v34 }
 0x133   :  { %667 = vmatprep.subr.bf16.mxu1 %v799_v0 }
 0x136   :  { %668 = vmatpush3.bf16.msra.mxu1 %v717_v35 }
 0x137   :  { %669 = vmatprep.subr.bf16.mxu1 %v799_v0 }
 0x13a   :  { %670 = vmatpush3.bf16.msra.mxu1 %v718_v36 }
 0x13b   :  { %671 = vmatprep.subr.bf16.mxu1 %v799_v0 }
 0x13e   :  { %672 = vmatpush3.bf16.msra.mxu1 %v719_v37 }
 0x13f   :  { %673 = vmatprep.subr.bf16.mxu1 %v799_v0 }
 0x142   :  { %674 = vmatpush3.bf16.msra.mxu1 %v720_v38 }
 0x143   :  { %675 = vmatprep.subr.bf16.mxu1 %v799_v0 }
 0x146   :  { %676 = vmatpush3.bf16.msra.mxu1 %v721_v39 }
 0x147   :  { %677 = vmatprep.subr.bf16.mxu1 %v799_v0 }
 0x14a   :  { %678 = vmatpush3.bf16.msra.mxu1 %v722_v48 }
 0x14b   :  { %679 = vmatprep.subr.bf16.mxu1 %v799_v0 }
 0x14e   :  { %680 = vmatpush3.bf16.msra.mxu1 %v723_v49 }
 0x204   :  { %v293_v41 = vpop.f32.mrb[0].mxu1 }
 0x205   :  { %v294_v42 = vadd.f32 %v542_v40, %v293_v41  ;;  %v643_v43 = vpop.f32.mrb[1].mxu1 }
 0x206   :  { %v296_v44 = vpop.f32.mrb[2].mxu1 }
 0x207   :  { %v299_v45 = vmax.f32 %v294_v42, 0.0  ;;  %v644_v46 = vpop.f32.mrb[3].mxu1 }
 0x209   :  { %v300_v47 = vpack.c.bf16 %v299_v45, %v299_v45 }
 0x20b   :  { %662 = vmatmul.mubr.bf16.vlgmr.msra.gmra.mrb[4].mxu0 %v300_v47 }
 0x2de   :  { %v406_v51 = vpop.f32.mrb[4].mxu0 }
 0x2df   :  { %v407_v52 = vadd.f32 %v551_v50, %v406_v51  ;;  %v663_v53 = vpop.f32.mrb[5].mxu0 }
 0x2e0   :  { %v409_v54 = vpop.f32.mrb[6].mxu0 }
 0x2e1   :  { %v412_v55 = vmax.f32 %v407_v52, 0.0  ;;  %v664_v56 = vpop.f32.mrb[7].mxu0 }
 0x2e3   :  { %v413_v57 = vpack.c.bf16 %v412_v55, %v412_v55 }
 0x2e5   :  { %682 = vmatmul.mubr.bf16.vlgmr.msra.gmra.mrb[4].mxu1 %v413_v57 }
 0x3b8   :  { %v519_v59 = vpop.f32.mrb[4].mxu1 }
 0x3b9   :  { %v520_v60 = vadd.f32 %v560_v58, %v519_v59  ;;  %v683_v61 = vpop.f32.mrb[5].mxu1 }
 0x3ba   :  { %v522_v62 = vpop.f32.mrb[6].mxu1 }
 0x3bb   :  { %v525_v63 = vmax.f32 %v520_v60, 0.0  ;;  %v684_v0 = vpop.f32.mrb[7].mxu1 }
 0x3bd   :  { %526 = vst [vmem:[%s994_s9] sm:$0xff] %v525_v63 }
 0x3be   :  { %531 = vsyncpa [#allocation3], 1 }
 0x3bf   :  { %532 = vsyncpa [#allocation5], 1 }

</bundles_post_ra>
